<compile_context>
chip_gen: v6e
topology: v6e:2x2x1
jax: 0.10.0
libtpu: 0.0.40
codegen_flags: <defaults>
</compile_context>

<pallas_src>
import jax
import jax.numpy as jnp
from jax.experimental import pallas as pl
from jax.experimental.pallas import tpu as pltpu


def _box_norm_kernel(x_ref, mean_ref, half_ref, loc_ref, scale_ref, mode_ref):
    # x_ref    : (tb, 2A)  -- one contiguous DMA of the packed [gmean | grawstd] rows
    # mean_ref : (1, A), half_ref : (1, A)  -- broadcast over batch sublanes
    # loc_ref / scale_ref / mode_ref : (tb, A)
    A = loc_ref.shape[-1]
    x = x_ref[...]
    gmean = x[:, :A]
    grawstd = x[:, A:]
    loc_ref[...] = gmean
    scale_ref[...] = jax.nn.softplus(grawstd) + 1e-4
    mode_ref[...] = mean_ref[...] + half_ref[...] * jnp.tanh(gmean)


def _pick_tile_b(B, A, target_bytes=2 * 1024 * 1024):
    """Rows per grid step, sized by bytes moved per step.

    Per-row traffic: input 2A + outputs 3A floats.  tb is a multiple of 8 (or
    the full batch dim) so the block's second-minor dim satisfies the (8, 128)
    tiling rule; when B >= 16 we force >= 2 grid steps so megacore sharding and
    the DMA/compute pipeline have work to overlap.
    """
    row_bytes = 5 * A * 4
    tb = max(8, target_bytes // max(row_bytes, 1))
    if B >= 16:
        half = -(-B // 2)            # ceil(B / 2)
        half = -(-half // 8) * 8     # rounded up to a multiple of 8
        tb = min(tb, half)
    if tb >= B:
        return B                     # block == full dim is always legal
    tb = max((tb // 8) * 8, 8)
    return tb


def box_output_linear_normalization(feature, action_mean, half_len):
    """feature: (B, 2*A) float32; action_mean/half_len: (A,) float32.

    Returns (loc, scale, mode), each (B, A) float32.
    """
    B, two_a = feature.shape
    A = action_mean.shape[0]
    assert two_a == 2 * A, "feature last dim must be 2 * action_dim"

    feature = feature.astype(jnp.float32)
    mean2d = action_mean.reshape(1, A).astype(jnp.float32)
    half2d = half_len.reshape(1, A).astype(jnp.float32)

    tb = _pick_tile_b(B, A)
    grid = (pl.cdiv(B, tb),)

    out_shape = (
        jax.ShapeDtypeStruct((B, A), jnp.float32),   # loc
        jax.ShapeDtypeStruct((B, A), jnp.float32),   # scale
        jax.ShapeDtypeStruct((B, A), jnp.float32),   # mode
    )

    loc, scale, mode = pl.pallas_call(
        _box_norm_kernel,
        out_shape=out_shape,
        grid_spec=pltpu.PrefetchScalarGridSpec(
            num_scalar_prefetch=0,
            grid=grid,
            in_specs=[
                # One contiguous (tb, 2A) tile of the packed feature rows.
                pl.BlockSpec((tb, 2 * A), lambda i: (i, 0)),
                # Per-action-dim constants, broadcast over the batch tile.
                pl.BlockSpec((1, A), lambda i: (0, 0)),
                pl.BlockSpec((1, A), lambda i: (0, 0)),
            ],
            out_specs=[
                pl.BlockSpec((tb, A), lambda i: (i, 0)),
                pl.BlockSpec((tb, A), lambda i: (i, 0)),
                pl.BlockSpec((tb, A), lambda i: (i, 0)),
            ],
        ),
        compiler_params=pltpu.CompilerParams(
            dimension_semantics=("parallel",),
        ),
    )(feature, mean2d, half2d)

    return loc, scale, mode


def _reference(feature, action_mean, half_len):
    A = action_mean.shape[0]
    gmean = feature[:, :A]
    grawstd = feature[:, A:]
    scale = jax.nn.softplus(grawstd) + 1e-4
    mode = action_mean[None, :] + half_len[None, :] * jnp.tanh(gmean)
    return gmean, scale, mode


if __name__ == "__main__":
    key = jax.random.PRNGKey(0)

    # Primary shape: batch=8, action dim=8 -> input_size = 2*A = 16.
    B, A = 8, 8
    low = -1.5 * jnp.ones((A,), jnp.float32)
    high = 0.5 * jnp.ones((A,), jnp.float32)
    action_mean = (high + low) / 2.0
    half_len = jnp.maximum((high - low) / 2.0, 0.001)   # clamp_min(0.001)
    feature = jax.random.normal(key, (B, 2 * A), dtype=jnp.float32)

    loc, scale, mode = box_output_linear_normalization(feature, action_mean, half_len)
    jax.block_until_ready((loc, scale, mode))

    rloc, rscale, rmode = _reference(feature, action_mean, half_len)
    assert jnp.allclose(loc, rloc, atol=1e-5)
    assert jnp.allclose(scale, rscale, atol=1e-5)
    assert jnp.allclose(mode, rmode, atol=1e-5)

    # Second shape exercises multi-step grid with a partial last batch tile.
    B2, A2 = 200, 40
    low2 = jnp.linspace(-2.0, -0.5, A2).astype(jnp.float32)
    high2 = jnp.linspace(0.5, 2.0, A2).astype(jnp.float32)
    am2 = (high2 + low2) / 2.0
    hl2 = jnp.maximum((high2 - low2) / 2.0, 0.001)
    feat2 = jax.random.normal(jax.random.PRNGKey(0), (B2, 2 * A2), dtype=jnp.float32)

    l2, s2, m2 = box_output_linear_normalization(feat2, am2, hl2)
    jax.block_until_ready((l2, s2, m2))

    rl2, rs2, rm2 = _reference(feat2, am2, hl2)
    assert jnp.allclose(l2, rl2, atol=1e-5)
    assert jnp.allclose(s2, rs2, atol=1e-5)
    assert jnp.allclose(m2, rm2, atol=1e-5)

    print("KERNEL_OK")
</pallas_src>

<mosaic_0001>
module attributes {stable_mosaic.version = 11 : i64} {
  func.func @_box_norm_kernel(%arg0: i32, %arg1: memref<8x16xf32, #tpu.memory_space<vmem>>, %arg2: memref<1x8xf32, #tpu.memory_space<vmem>>, %arg3: memref<1x8xf32, #tpu.memory_space<vmem>>, %arg4: memref<8x8xf32, #tpu.memory_space<vmem>>, %arg5: memref<8x8xf32, #tpu.memory_space<vmem>>, %arg6: memref<8x8xf32, #tpu.memory_space<vmem>>) attributes {dimension_semantics = [#tpu.dimension_semantics<parallel>], iteration_bounds = array<i64: 1>, scalar_prefetch = 0 : i64, scratch_operands = 0 : i64, tpu.core_type = #tpu.core_type<tc>, window_params = [{transform_indices = @transform_0, window_bounds = array<i64: 8, 16>}, {pipeline_mode = #tpu.pipeline_mode<synchronous>, transform_indices = @transform_1, window_bounds = array<i64: 1, 8>}, {pipeline_mode = #tpu.pipeline_mode<synchronous>, transform_indices = @transform_2, window_bounds = array<i64: 1, 8>}, {transform_indices = @transform_3, window_bounds = array<i64: 8, 8>}, {transform_indices = @transform_4, window_bounds = array<i64: 8, 8>}, {transform_indices = @transform_5, window_bounds = array<i64: 8, 8>}]} {
    %c0 = arith.constant 0 : index
    %c0_0 = arith.constant 0 : index
    %0 = vector.load %arg1[%c0, %c0_0] : memref<8x16xf32, #tpu.memory_space<vmem>>, vector<8x16xf32>
    %1 = vector.extract_strided_slice %0 {offsets = [0, 0], sizes = [8, 8], strides = [1, 1]} : vector<8x16xf32> to vector<8x8xf32>
    %2 = vector.extract_strided_slice %0 {offsets = [0, 8], sizes = [8, 8], strides = [1, 1]} : vector<8x16xf32> to vector<8x8xf32>
    %c0_1 = arith.constant 0 : index
    %c0_2 = arith.constant 0 : index
    %3 = vector.load %arg4[%c0_1, %c0_2] : memref<8x8xf32, #tpu.memory_space<vmem>>, vector<8x8xf32>
    tpu.vector_store %arg4[%c0_1, %c0_2], %1 {strides = array<i32>} : memref<8x8xf32, #tpu.memory_space<vmem>>, vector<8x8xf32>,
    %cst = arith.constant 0.000000e+00 : f32
    %4 = vector.broadcast %cst : f32 to vector<8x8xf32>
    %5 = arith.maximumf %2, %4 : vector<8x8xf32>
    %6 = vector.broadcast %cst : f32 to vector<8x8xf32>
    %7 = arith.subf %2, %6 : vector<8x8xf32>
    %8 = arith.cmpf one, %7, %7 : vector<8x8xf32>
    %9 = vector.broadcast %cst : f32 to vector<8x8xf32>
    %10 = arith.addf %2, %9 : vector<8x8xf32>
    %11 = math.absf %7 : vector<8x8xf32>
    %cst_3 = arith.constant 0.000000e+00 : f32
    %12 = vector.broadcast %cst_3 : f32 to vector<8x8xf32>
    %13 = arith.subf %12, %11 : vector<8x8xf32>
    %14 = math.exp %13 : vector<8x8xf32>
    %15 = math.log1p %14 : vector<8x8xf32>
    %16 = arith.addf %5, %15 : vector<8x8xf32>
    %17 = arith.select %8, %10, %16 : vector<8x8xi1>, vector<8x8xf32>
    %cst_4 = arith.constant 9.99999974E-5 : f32
    %18 = vector.broadcast %cst_4 : f32 to vector<8x8xf32>
    %19 = arith.addf %17, %18 : vector<8x8xf32>
    %c0_5 = arith.constant 0 : index
    %c0_6 = arith.constant 0 : index
    %20 = vector.load %arg5[%c0_5, %c0_6] : memref<8x8xf32, #tpu.memory_space<vmem>>, vector<8x8xf32>
    tpu.vector_store %arg5[%c0_5, %c0_6], %19 {strides = array<i32>} : memref<8x8xf32, #tpu.memory_space<vmem>>, vector<8x8xf32>,
    %c0_7 = arith.constant 0 : index
    %c0_8 = arith.constant 0 : index
    %21 = vector.load %arg2[%c0_7, %c0_8] : memref<1x8xf32, #tpu.memory_space<vmem>>, vector<1x8xf32>
    %c0_9 = arith.constant 0 : index
    %c0_10 = arith.constant 0 : index
    %22 = vector.load %arg3[%c0_9, %c0_10] : memref<1x8xf32, #tpu.memory_space<vmem>>, vector<1x8xf32>
    %23 = math.tanh %1 : vector<8x8xf32>
    %24 = vector.broadcast %22 : vector<1x8xf32> to vector<8x8xf32>
    %25 = arith.mulf %24, %23 : vector<8x8xf32>
    %26 = vector.broadcast %21 : vector<1x8xf32> to vector<8x8xf32>
    %27 = arith.addf %26, %25 : vector<8x8xf32>
    %c0_11 = arith.constant 0 : index
    %c0_12 = arith.constant 0 : index
    %28 = vector.load %arg6[%c0_11, %c0_12] : memref<8x8xf32, #tpu.memory_space<vmem>>, vector<8x8xf32>
    tpu.vector_store %arg6[%c0_11, %c0_12], %27 {strides = array<i32>} : memref<8x8xf32, #tpu.memory_space<vmem>>, vector<8x8xf32>,
    return
  }
  func.func @transform_0(%arg0: i32) -> (i32, i32) {
    %c0_i32 = arith.constant 0 : i32
    %c0_i32_0 = arith.constant 0 : i32
    return %arg0, %c0_i32 : i32, i32
  }
  func.func @transform_1(%arg0: i32) -> (i32, i32) {
    %c0_i32 = arith.constant 0 : i32
    %c0_i32_0 = arith.constant 0 : i32
    %c0_i32_1 = arith.constant 0 : i32
    return %c0_i32, %c0_i32_0 : i32, i32
  }
  func.func @transform_2(%arg0: i32) -> (i32, i32) {
    %c0_i32 = arith.constant 0 : i32
    %c0_i32_0 = arith.constant 0 : i32
    %c0_i32_1 = arith.constant 0 : i32
    return %c0_i32, %c0_i32_0 : i32, i32
  }
  func.func @transform_3(%arg0: i32) -> (i32, i32) {
    %c0_i32 = arith.constant 0 : i32
    %c0_i32_0 = arith.constant 0 : i32
    return %arg0, %c0_i32 : i32, i32
  }
  func.func @transform_4(%arg0: i32) -> (i32, i32) {
    %c0_i32 = arith.constant 0 : i32
    %c0_i32_0 = arith.constant 0 : i32
    return %arg0, %c0_i32 : i32, i32
  }
  func.func @transform_5(%arg0: i32) -> (i32, i32) {
    %c0_i32 = arith.constant 0 : i32
    %c0_i32_0 = arith.constant 0 : i32
    return %arg0, %c0_i32 : i32, i32
  }
}

</mosaic_0001>

<bundles_post_ra>
// kernel: tpu_custom_call.1
= control target key start
LH: loop header
LB: loop body
LE: loop exit
PB: predicated region body
PF: predicated region fallthrough
CT: control target
= control target key end

     0   :  { %11 = vsyncpa [#allocation3], 0  ;;  %s273_s0 = inlined_call_operand.hbm [shape: f32[8,16], index: 0, kind: input, shape index: {}]   ;;  %s274_s1 = inlined_call_operand.vmem [shape: f32[1,8], index: 1, kind: input, shape index: {}]   ;;  %s275_s2 = inlined_call_operand.vmem [shape: f32[1,8], index: 2, kind: input, shape index: {}]   ;;  %s276_s3 = inlined_call_operand.hbm [shape: f32[8,8], index: 3, kind: output, shape index: {0}]   ;;  %s277_s4 = inlined_call_operand.hbm [shape: f32[8,8], index: 4, kind: output, shape index: {1}]   ;;  %s278_s5 = inlined_call_operand.hbm [shape: f32[8,8], index: 5, kind: output, shape index: {2}]  }
   0x1   :  { %12 = vsyncpa [#allocation4], 0 }
   0x2   :  { %13 = vsyncpa [#allocation7], 0  ;;  %s217_s18 = smov [#allocation2]  }
   0x3   :  { %s20_s19 = sshll.u32 %s217_s18, 4  ;;  %s21_s19 = int_to_ptr.vmem [resolvable:$true] %s20_s19 }
   0x4   :  { %s139_s20 = scalar_lea.vmem %s21_s19, 128  ;;  %p144_p1 = scmp.lt.s32.totalorder %s21_s19, %s21_s19 }
   0x5   :  { %p140_p0 = scmp.ne.s32.totalorder %s21_s19, %s139_s20  ;;  %p145_p2 = scmp.lt.s32.totalorder %s139_s20, %s139_s20 }
   0x7   :  { %p146_p3 = por %p145_p2, %p144_p1 }
   0x9   :  { %p147_p4 = pnand %p146_p3, %p140_p0 }
   0xb   :  { %150 = shalt.err (!%p147_p4)
}
   0xc   :  { %23 = dma.hbm_to_vmem [thread:$0]  %s273_s0, 128, %s21_s19, [#allocation3]  }
   0xd   :  { %211 = dma.done.wait [#allocation3], 128  }
   0xe   :  { %212 = vsyncadd [#allocation3], 4294967168  ;;  %v31_v0 = vld [vmem:[#allocation2] sm:$0xff]  ;;  %vm32_vm0 = vcmask 64512   ;;  %s218_s26 = smov [#allocation5]  }
   0xf   :  { %v37_v1 = vand.u32 2147483647, %v31_v0  ;;  %v118_v8 = vld [vmem:[%s275_s2] ss:$0 sm:$0xff]  ;;  %33 = vst.msk [vmem:[#allocation5] sm:$0xff] %vm32_vm0, %v31_v0  ;;  %s82_s27 = sshll.u32 %s218_s26, 4  ;;  %s83_s27 = int_to_ptr.vmem [resolvable:$true] %s82_s27 }
  0x10   :  { %v119_v10 = vld [vmem:[%s274_s1] ss:$0 sm:$0xff]  ;;  %s151_s28 = scalar_lea.vmem %s83_s27, 128  ;;  %p156_p6 = scmp.lt.s32.totalorder %s83_s27, %s83_s27 }
  0x11   :  { %v38_v2 = vsub.f32 0.0, %v37_v1  ;;  %p152_p5 = scmp.ne.s32.totalorder %s83_s27, %s151_s28  ;;  %p157_p7 = scmp.lt.s32.totalorder %s151_s28, %s151_s28 }
  0x13   :  { %v39_v3 = vmul.f32 1.442695, %v38_v2  ;;  %p158_p8 = por %p157_p7, %p156_p6 }
  0x15   :  { %125 = vpow2.f32 %v39_v3  ;;  %p159_p9 = pnand %p158_p8, %p152_p5 }
  0x16   :  { %127 = vtanh.f32 %v31_v0 }
  0x22   :  { %v126_v4 = vpop.eup %125 }
  0x23   :  { %v41_v5 = vadd.f32 1.0, %v126_v4  ;;  %v128_v6 = vpop.eup %127  ;;  %v44_v7 = vmul.f32 -0.5, %v126_v4  ;;  %v47_v13 = vand.u32 2147483647, %v126_v4 }
  0x24   :  { %v67_v9 = vmul.f32 %v128_v6, %v118_v8 }
  0x25   :  { %129 = vlog2.f32 %v41_v5  ;;  %v45_v11 = vadd.f32 1.0, %v44_v7 }
  0x26   :  { %v74_v12 = vadd.f32 %v119_v10, %v67_v9 }
  0x28   :  { %75 = vst.msk [vmem:[#allocation8] sm:$0xff] %vm32_vm0, %v74_v12 }
  0x29   :  { %162 = shalt.err (!%p159_p9)
}
  0x2a   :  { %85 = dma.vmem_to_hbm [thread:$0]  %s83_s27, 128, %s276_s3, [#allocation4]   ;;  %v46_v14 = vmul.f32 %v126_v4, %v45_v11  ;;  %v34_v16 = vmax.f32 %v31_v0, 0.0  ;;  %vm48_vm1 = vcmp.lt.f32.partialorder %v47_v13, 0.0004427343  ;;  %vm35_vm2 = vcmp.ne.f32.partialorder %v31_v0, %v31_v0 }
  0x2b   :  { %s219_s29 = smov 120   ;;  %s220_s30 = smov [#allocation6]  }
  0x2c   :  { %s92_s6 = sshll.u32 %s220_s30, 4  ;;  %s221_s7 = smov [#allocation8]   ;;  %s93_s6 = int_to_ptr.vmem [resolvable:$true] %s92_s6 }
  0x2d   :  { %s102_s8 = sshll.u32 %s221_s7, 4  ;;  %s171_s3 = scalar_lea.vmem %s93_s6, 128  ;;  %s103_s8 = int_to_ptr.vmem [resolvable:$true] %s102_s8 }
  0x2e   :  { %p172_p10 = scmp.ne.s32.totalorder %s93_s6, %s171_s3  ;;  %p176_p11 = scmp.lt.s32.totalorder %s93_s6, %s93_s6 }
  0x2f   :  { %p177_p12 = scmp.lt.s32.totalorder %s171_s3, %s171_s3 }
  0x31   :  { %p178_p13 = por %p177_p12, %p176_p11 }
  0x32   :  { %v130_v15 = vpop.eup %129 }
  0x33   :  { %v43_v17 = vmul.f32 0.6931472, %v130_v15  ;;  %p179_p0 = pnand %p178_p13, %p172_p10 }
  0x35   :  { %v49_v18 = vsel %vm48_vm1, %v46_v14, %v43_v17 }
  0x36   :  { %v50_v19 = vadd.f32 %v49_v18, %v34_v16 }
  0x38   :  { %v51_v20 = vsel %vm35_vm2, %v31_v0, %v50_v19 }
  0x39   :  { %v52_v21 = vadd.f32 0.0001, %v51_v20 }
  0x3b   :  { %54 = vrot.lane.b32.xlu0 %v52_v21, %s219_s29 }
  0xad   :  { %v55_v22 = vpop.permute.xlu0 %54 }
  0xae   :  { %57 = vst.msk [vmem:[#allocation6] sm:$0xff] %vm32_vm0, %v55_v22 }
  0xaf   :  { %182 = shalt.err (!%p179_p0)
}
  0xb0   :  { %95 = dma.vmem_to_hbm [thread:$0]  %s93_s6, 128, %s277_s4, [#allocation7]  }
  0xb1   :  { %s191_s11 = scalar_lea.vmem %s103_s8, 128  ;;  %p196_p2 = scmp.lt.s32.totalorder %s103_s8, %s103_s8 }
  0xb2   :  { %p192_p1 = scmp.ne.s32.totalorder %s103_s8, %s191_s11  ;;  %p197_p3 = scmp.lt.s32.totalorder %s191_s11, %s191_s11 }
  0xb4   :  { %p198_p4 = por %p197_p3, %p196_p2 }
  0xb6   :  { %p199_p5 = pnand %p198_p4, %p192_p1 }
  0xb8   :  { %202 = shalt.err (!%p199_p5)
}
  0xb9   :  { %105 = dma.vmem_to_hbm [thread:$0]  %s103_s8, 128, %s278_s5, [#allocation7]  }
  0xba   :  { %213 = dma.done.wait [#allocation4], 128  }
  0xbb   :  { %214 = vsyncadd [#allocation4], 4294967168 }
  0xbc   :  { %215 = dma.done.wait [#allocation7], 256  }
  0xbd   :  { %216 = vsyncadd [#allocation7], 4294967040 }
  0xbe   :  { %115 = vsyncpa [#allocation3], 1 }
  0xbf   :  { %116 = vsyncpa [#allocation4], 1 }
  0xc0   :  { %117 = vsyncpa [#allocation7], 1 }

</bundles_post_ra>
